<compile_context>
chip_gen: v7x
topology: tpu7x:2x2x1
jax: 0.10.0
libtpu: 0.0.40
codegen_flags: <defaults>
</compile_context>

<pallas_src>
from abc import ABC, abstractmethod
import math

import jax
import jax.numpy as jnp
from jax.experimental import pallas as pl
from jax.experimental.pallas import tpu as pltpu

LANE = 128
SUBLANE = 8
# Elements per block: 512Ki = 2 MiB per f32 stream; 2 buffers x 3 streams ~ 12 MiB VMEM.
MAX_BLOCK_ELEMS = 512 * 1024
VMEM_LIMIT_BYTES = 32 * 1024 * 1024  # safe on v5e/v6e (128 MiB phys) and v7x (64 MiB phys)


def _fold_shape(size: int) -> tuple:
    """2-D 'folded' view of a flat tensor that is a FREE (bitcast) reshape.

    size % 8 == 0  -> (8, size//8): dense 8x128 vreg tiles along the lane axis.
    otherwise      -> (1, size):    lane-only layout (only tiny/odd tensors)."""
    if size % SUBLANE == 0:
        return (SUBLANE, size // SUBLANE)
    return (1, size)


class BaseShadowPallas(ABC):
    """JAX/Pallas analogue of BaseShadow.

    Holds the shadow state dict as persistent per-tensor f32 accumulators and
    applies the abstract elementwise `_forward(shadow, param, scalars)` with
    one Pallas kernel per tensor (all dispatched from a single jit'd step,
    params read in native dtype straight from the tracked module)."""

    def __init__(self, module_state: dict):
        # (no BatchNorm check needed: the synthetic module has none)
        self._specs = tuple(
            (name, tuple(t.shape), t.dtype, int(math.prod(t.shape)),
             _fold_shape(int(math.prod(t.shape))))
            for name, t in module_state.items()
        )
        # Shadow lives permanently as folded f32 accumulators (cast/fold once).
        self._shadow = {
            name: module_state[name].reshape(folded).astype(jnp.float32)
            for name, _, _, _, folded in self._specs
        }
        self._calls = {
            name: self._make_tensor_call(size, folded, dtype)
            for name, _, dtype, size, folded in self._specs
        }
        self._jitted_step = None

    # ------------------------------------------------------------------ kernels
    def _make_tensor_call(self, size: int, folded: tuple, param_dtype):
        rows, cols = folded
        max_cols = (MAX_BLOCK_ELEMS // rows) // LANE * LANE     # multiple of 128
        block_cols = cols if cols <= max_cols else max_cols
        grid = (pl.cdiv(cols, block_cols),)                     # edge block handled by Pallas

        def kernel(scalars_ref, shadow_ref, param_ref, out_ref):
            # Native-dtype param block; cast + elementwise update happen here,
            # hidden under the DMA of the next block.
            out_ref[...] = self._forward(shadow_ref[...], param_ref[...], scalars_ref)

        bytes_per_elem = 4 + jnp.dtype(param_dtype).itemsize + 4
        return pl.pallas_call(
            kernel,
            out_shape=jax.ShapeDtypeStruct((rows, cols), jnp.float32),
            grid=grid,
            in_specs=[
                pl.BlockSpec(memory_space=pltpu.MemorySpace.SMEM),   # per-step scalars (decay)
                pl.BlockSpec((rows, block_cols), lambda i: (0, i)),  # shadow tile (f32)
                pl.BlockSpec((rows, block_cols), lambda i: (0, i)),  # param tile (native dtype)
            ],
            out_specs=pl.BlockSpec((rows, block_cols), lambda i: (0, i)),
            input_output_aliases={1: 0},                             # in-place shadow update
            compiler_params=pltpu.CompilerParams(
                dimension_semantics=("parallel",),
                vmem_limit_bytes=VMEM_LIMIT_BYTES,
            ),
            cost_estimate=pl.CostEstimate(
                flops=3 * size,
                transcendentals=0,
                bytes_accessed=size * bytes_per_elem,
            ),
        )

    # ------------------------------------------------------------------ shadow access
    @property
    def shadow(self) -> dict:
        # Read-out view: back to original shape/dtype (re-materializes on access).
        return {
            name: self._shadow[name].reshape(shape).astype(dtype)
            for name, shape, dtype, _, _ in self._specs
        }

    @shadow.setter
    def shadow(self, value: dict) -> None:
        self._shadow = {
            name: value[name].reshape(folded).astype(jnp.float32)
            for name, _, _, _, folded in self._specs
        }

    # ------------------------------------------------------------------ abstract op
    @abstractmethod
    def _forward(self, shadow_block: jax.Array, param_block: jax.Array,
                 scalars_ref) -> jax.Array:
        """Elementwise update applied inside the kernel to one VMEM block.

        shadow_block: f32 shadow accumulator values.
        param_block : module parameter values at the same positions (native dtype).
        scalars_ref : (k,) f32 SMEM ref of per-step runtime scalars (see
                      _step_scalars), e.g. the EMA decay."""

    def _step_scalars(self) -> jax.Array:
        """Per-step runtime scalars forwarded to every kernel via SMEM."""
        return jnp.zeros((1,), jnp.float32)

    # ------------------------------------------------------------------ forward
    def _step(self, shadow: dict, scalars: jax.Array, module_state: dict) -> dict:
        new = {}
        for name, _, _, _, folded in self._specs:
            # reshape to the folded view is a free bitcast for contiguous
            # arrays: no packed slab, no pad, no host-side cast.
            new[name] = self._calls[name](
                scalars, shadow[name], module_state[name].reshape(folded)
            )
        return new

    def forward(self, module_state: dict) -> None:
        if self._jitted_step is None:
            # Donate the shadow buffers so the aliased pallas_call outputs
            # reuse them in place (no extra output allocation / copy).
            self._jitted_step = jax.jit(self._step, donate_argnums=(0,))
        self._shadow = self._jitted_step(self._shadow, self._step_scalars(), module_state)


class EMAShadowPallas(BaseShadowPallas):
    """shadow <- decay * shadow + (1 - decay) * param   (decay may vary per step)."""

    def __init__(self, module_state: dict, decay: float = 0.999):
        super().__init__(module_state)
        self.decay = float(decay)  # mutable between steps; no recompilation

    def _step_scalars(self) -> jax.Array:
        return jnp.asarray([self.decay], dtype=jnp.float32)

    def _forward(self, shadow_block, param_block, scalars_ref):
        d = scalars_ref[0]
        return shadow_block * d + param_block.astype(jnp.float32) * (1.0 - d)


def _make_state_dict(key) -> dict:
    """Deterministic synthetic state dict of a small conv+linear module
    (PyTorch conventions: conv OIHW, linear [out, in])."""
    k = jax.random.split(key, 4)
    return {
        "conv.weight": jax.random.normal(k[0], (4, 3, 3, 3), jnp.float32),
        "conv.bias": jax.random.normal(k[1], (4,), jnp.float32),
        "fc.weight": jax.random.normal(k[2], (10, 16), jnp.float32),
        "fc.bias": jax.random.normal(k[3], (10,), jnp.float32),
    }


if __name__ == "__main__":
    key = jax.random.PRNGKey(0)
    k0, k1, k2 = jax.random.split(key, 3)

    initial_state = _make_state_dict(k0)   # module state at shadow construction
    state_step1 = _make_state_dict(k1)     # module after "optimizer step" 1
    state_step2 = _make_state_dict(k2)     # module after "optimizer step" 2

    shadow = EMAShadowPallas(initial_state, decay=0.9)
    shadow.forward(state_step1)            # shadow <- 0.9*shadow + 0.1*params
    shadow.decay = 0.5                     # per-step decay schedule, no recompile
    shadow.forward(state_step2)            # shadow <- 0.5*shadow + 0.5*params

    # Pure-JAX reference of the two EMA steps.
    ref = {}
    for name in initial_state:
        s1 = 0.9 * initial_state[name] + 0.1 * state_step1[name]
        ref[name] = 0.5 * s1 + 0.5 * state_step2[name]

    ok = True
    result = shadow.shadow
    for name in initial_state:
        got = jax.block_until_ready(result[name])
        ok &= bool(jnp.allclose(got, ref[name], atol=1e-6, rtol=1e-6))
        ok &= got.shape == initial_state[name].shape
        ok &= got.dtype == initial_state[name].dtype

    print("KERNEL_OK" if ok else "KERNEL_MISMATCH")
</pallas_src>

<mosaic_0001>
module attributes {stable_mosaic.version = 11 : i64} {
  func.func @kernel(%arg0: i32, %arg1: memref<1xf32, #tpu.memory_space<smem>>, %arg2: memref<8x20xf32, #tpu.memory_space<vmem>>, %arg3: memref<8x20xf32, #tpu.memory_space<vmem>>, %arg4: memref<8x20xf32, #tpu.memory_space<vmem>>) attributes {dimension_semantics = [#tpu.dimension_semantics<parallel>], iteration_bounds = array<i64: 1>, scalar_prefetch = 0 : i64, scratch_operands = 0 : i64, tpu.core_type = #tpu.core_type<tc>, window_params = [{transform_indices = @transform_0, window_bounds = array<i64: 1>}, {transform_indices = @transform_1, window_bounds = array<i64: 8, 20>}, {transform_indices = @transform_2, window_bounds = array<i64: 8, 20>}, {transform_indices = @transform_3, window_bounds = array<i64: 8, 20>}]} {
    %c0 = arith.constant 0 : index
    %c0_0 = arith.constant 0 : index
    %0 = vector.load %arg2[%c0, %c0_0] : memref<8x20xf32, #tpu.memory_space<vmem>>, vector<8x20xf32>
    %c0_1 = arith.constant 0 : index
    %c0_2 = arith.constant 0 : index
    %1 = vector.load %arg3[%c0_1, %c0_2] : memref<8x20xf32, #tpu.memory_space<vmem>>, vector<8x20xf32>
    %c0_3 = arith.constant 0 : index
    %2 = memref.load %arg1[%c0_3] : memref<1xf32, #tpu.memory_space<smem>>
    %3 = vector.broadcast %2 : f32 to vector<8x20xf32>
    %4 = arith.mulf %0, %3 : vector<8x20xf32>
    %cst = arith.constant 1.000000e+00 : f32
    %5 = arith.subf %cst, %2 : f32
    %6 = vector.broadcast %5 : f32 to vector<8x20xf32>
    %7 = arith.mulf %1, %6 : vector<8x20xf32>
    %8 = arith.addf %4, %7 : vector<8x20xf32>
    %c0_4 = arith.constant 0 : index
    %c0_5 = arith.constant 0 : index
    %9 = vector.load %arg4[%c0_4, %c0_5] : memref<8x20xf32, #tpu.memory_space<vmem>>, vector<8x20xf32>
    tpu.vector_store %arg4[%c0_4, %c0_5], %8 {strides = array<i32>} : memref<8x20xf32, #tpu.memory_space<vmem>>, vector<8x20xf32>,
    return
  }
  func.func @transform_0(%arg0: i32) -> i32 {
    %c0_i32 = arith.constant 0 : i32
    %c0_i32_0 = arith.constant 0 : i32
    return %c0_i32 : i32
  }
  func.func @transform_1(%arg0: i32) -> (i32, i32) {
    %c0_i32 = arith.constant 0 : i32
    %c0_i32_0 = arith.constant 0 : i32
    return %c0_i32, %arg0 : i32, i32
  }
  func.func @transform_2(%arg0: i32) -> (i32, i32) {
    %c0_i32 = arith.constant 0 : i32
    %c0_i32_0 = arith.constant 0 : i32
    return %c0_i32, %arg0 : i32, i32
  }
  func.func @transform_3(%arg0: i32) -> (i32, i32) {
    %c0_i32 = arith.constant 0 : i32
    %c0_i32_0 = arith.constant 0 : i32
    return %c0_i32, %arg0 : i32, i32
  }
}

module attributes {stable_mosaic.version = 11 : i64} {
  func.func @kernel(%arg0: i32, %arg1: memref<1xf32, #tpu.memory_space<smem>>, %arg2: memref<1x10xf32, #tpu.memory_space<vmem>>, %arg3: memref<1x10xf32, #tpu.memory_space<vmem>>, %arg4: memref<1x10xf32, #tpu.memory_space<vmem>>) attributes {dimension_semantics = [#tpu.dimension_semantics<parallel>], iteration_bounds = array<i64: 1>, scalar_prefetch = 0 : i64, scratch_operands = 0 : i64, tpu.core_type = #tpu.core_type<tc>, window_params = [{transform_indices = @transform_0, window_bounds = array<i64: 1>}, {transform_indices = @transform_1, window_bounds = array<i64: 1, 10>}, {transform_indices = @transform_2, window_bounds = array<i64: 1, 10>}, {transform_indices = @transform_3, window_bounds = array<i64: 1, 10>}]} {
    %c0 = arith.constant 0 : index
    %c0_0 = arith.constant 0 : index
    %0 = vector.load %arg2[%c0, %c0_0] : memref<1x10xf32, #tpu.memory_space<vmem>>, vector<1x10xf32>
    %c0_1 = arith.constant 0 : index
    %c0_2 = arith.constant 0 : index
    %1 = vector.load %arg3[%c0_1, %c0_2] : memref<1x10xf32, #tpu.memory_space<vmem>>, vector<1x10xf32>
    %c0_3 = arith.constant 0 : index
    %2 = memref.load %arg1[%c0_3] : memref<1xf32, #tpu.memory_space<smem>>
    %3 = vector.broadcast %2 : f32 to vector<1x10xf32>
    %4 = arith.mulf %0, %3 : vector<1x10xf32>
    %cst = arith.constant 1.000000e+00 : f32
    %5 = arith.subf %cst, %2 : f32
    %6 = vector.broadcast %5 : f32 to vector<1x10xf32>
    %7 = arith.mulf %1, %6 : vector<1x10xf32>
    %8 = arith.addf %4, %7 : vector<1x10xf32>
    %c0_4 = arith.constant 0 : index
    %c0_5 = arith.constant 0 : index
    %9 = vector.load %arg4[%c0_4, %c0_5] : memref<1x10xf32, #tpu.memory_space<vmem>>, vector<1x10xf32>
    tpu.vector_store %arg4[%c0_4, %c0_5], %8 {strides = array<i32>} : memref<1x10xf32, #tpu.memory_space<vmem>>, vector<1x10xf32>,
    return
  }
  func.func @transform_0(%arg0: i32) -> i32 {
    %c0_i32 = arith.constant 0 : i32
    %c0_i32_0 = arith.constant 0 : i32
    return %c0_i32 : i32
  }
  func.func @transform_1(%arg0: i32) -> (i32, i32) {
    %c0_i32 = arith.constant 0 : i32
    %c0_i32_0 = arith.constant 0 : i32
    return %c0_i32, %arg0 : i32, i32
  }
  func.func @transform_2(%arg0: i32) -> (i32, i32) {
    %c0_i32 = arith.constant 0 : i32
    %c0_i32_0 = arith.constant 0 : i32
    return %c0_i32, %arg0 : i32, i32
  }
  func.func @transform_3(%arg0: i32) -> (i32, i32) {
    %c0_i32 = arith.constant 0 : i32
    %c0_i32_0 = arith.constant 0 : i32
    return %c0_i32, %arg0 : i32, i32
  }
}

module attributes {stable_mosaic.version = 11 : i64} {
  func.func @kernel(%arg0: i32, %arg1: memref<1xf32, #tpu.memory_space<smem>>, %arg2: memref<1x4xf32, #tpu.memory_space<vmem>>, %arg3: memref<1x4xf32, #tpu.memory_space<vmem>>, %arg4: memref<1x4xf32, #tpu.memory_space<vmem>>) attributes {dimension_semantics = [#tpu.dimension_semantics<parallel>], iteration_bounds = array<i64: 1>, scalar_prefetch = 0 : i64, scratch_operands = 0 : i64, tpu.core_type = #tpu.core_type<tc>, window_params = [{transform_indices = @transform_0, window_bounds = array<i64: 1>}, {transform_indices = @transform_1, window_bounds = array<i64: 1, 4>}, {transform_indices = @transform_2, window_bounds = array<i64: 1, 4>}, {transform_indices = @transform_3, window_bounds = array<i64: 1, 4>}]} {
    %c0 = arith.constant 0 : index
    %c0_0 = arith.constant 0 : index
    %0 = vector.load %arg2[%c0, %c0_0] : memref<1x4xf32, #tpu.memory_space<vmem>>, vector<1x4xf32>
    %c0_1 = arith.constant 0 : index
    %c0_2 = arith.constant 0 : index
    %1 = vector.load %arg3[%c0_1, %c0_2] : memref<1x4xf32, #tpu.memory_space<vmem>>, vector<1x4xf32>
    %c0_3 = arith.constant 0 : index
    %2 = memref.load %arg1[%c0_3] : memref<1xf32, #tpu.memory_space<smem>>
    %3 = vector.broadcast %2 : f32 to vector<1x4xf32>
    %4 = arith.mulf %0, %3 : vector<1x4xf32>
    %cst = arith.constant 1.000000e+00 : f32
    %5 = arith.subf %cst, %2 : f32
    %6 = vector.broadcast %5 : f32 to vector<1x4xf32>
    %7 = arith.mulf %1, %6 : vector<1x4xf32>
    %8 = arith.addf %4, %7 : vector<1x4xf32>
    %c0_4 = arith.constant 0 : index
    %c0_5 = arith.constant 0 : index
    %9 = vector.load %arg4[%c0_4, %c0_5] : memref<1x4xf32, #tpu.memory_space<vmem>>, vector<1x4xf32>
    tpu.vector_store %arg4[%c0_4, %c0_5], %8 {strides = array<i32>} : memref<1x4xf32, #tpu.memory_space<vmem>>, vector<1x4xf32>,
    return
  }
  func.func @transform_0(%arg0: i32) -> i32 {
    %c0_i32 = arith.constant 0 : i32
    %c0_i32_0 = arith.constant 0 : i32
    return %c0_i32 : i32
  }
  func.func @transform_1(%arg0: i32) -> (i32, i32) {
    %c0_i32 = arith.constant 0 : i32
    %c0_i32_0 = arith.constant 0 : i32
    return %c0_i32, %arg0 : i32, i32
  }
  func.func @transform_2(%arg0: i32) -> (i32, i32) {
    %c0_i32 = arith.constant 0 : i32
    %c0_i32_0 = arith.constant 0 : i32
    return %c0_i32, %arg0 : i32, i32
  }
  func.func @transform_3(%arg0: i32) -> (i32, i32) {
    %c0_i32 = arith.constant 0 : i32
    %c0_i32_0 = arith.constant 0 : i32
    return %c0_i32, %arg0 : i32, i32
  }
}

module attributes {stable_mosaic.version = 11 : i64} {
  func.func @kernel(%arg0: i32, %arg1: memref<1xf32, #tpu.memory_space<smem>>, %arg2: memref<1x108xf32, #tpu.memory_space<vmem>>, %arg3: memref<1x108xf32, #tpu.memory_space<vmem>>, %arg4: memref<1x108xf32, #tpu.memory_space<vmem>>) attributes {dimension_semantics = [#tpu.dimension_semantics<parallel>], iteration_bounds = array<i64: 1>, scalar_prefetch = 0 : i64, scratch_operands = 0 : i64, tpu.core_type = #tpu.core_type<tc>, window_params = [{transform_indices = @transform_0, window_bounds = array<i64: 1>}, {transform_indices = @transform_1, window_bounds = array<i64: 1, 108>}, {transform_indices = @transform_2, window_bounds = array<i64: 1, 108>}, {transform_indices = @transform_3, window_bounds = array<i64: 1, 108>}]} {
    %c0 = arith.constant 0 : index
    %c0_0 = arith.constant 0 : index
    %0 = vector.load %arg2[%c0, %c0_0] : memref<1x108xf32, #tpu.memory_space<vmem>>, vector<1x108xf32>
    %c0_1 = arith.constant 0 : index
    %c0_2 = arith.constant 0 : index
    %1 = vector.load %arg3[%c0_1, %c0_2] : memref<1x108xf32, #tpu.memory_space<vmem>>, vector<1x108xf32>
    %c0_3 = arith.constant 0 : index
    %2 = memref.load %arg1[%c0_3] : memref<1xf32, #tpu.memory_space<smem>>
    %3 = vector.broadcast %2 : f32 to vector<1x108xf32>
    %4 = arith.mulf %0, %3 : vector<1x108xf32>
    %cst = arith.constant 1.000000e+00 : f32
    %5 = arith.subf %cst, %2 : f32
    %6 = vector.broadcast %5 : f32 to vector<1x108xf32>
    %7 = arith.mulf %1, %6 : vector<1x108xf32>
    %8 = arith.addf %4, %7 : vector<1x108xf32>
    %c0_4 = arith.constant 0 : index
    %c0_5 = arith.constant 0 : index
    %9 = vector.load %arg4[%c0_4, %c0_5] : memref<1x108xf32, #tpu.memory_space<vmem>>, vector<1x108xf32>
    tpu.vector_store %arg4[%c0_4, %c0_5], %8 {strides = array<i32>} : memref<1x108xf32, #tpu.memory_space<vmem>>, vector<1x108xf32>,
    return
  }
  func.func @transform_0(%arg0: i32) -> i32 {
    %c0_i32 = arith.constant 0 : i32
    %c0_i32_0 = arith.constant 0 : i32
    return %c0_i32 : i32
  }
  func.func @transform_1(%arg0: i32) -> (i32, i32) {
    %c0_i32 = arith.constant 0 : i32
    %c0_i32_0 = arith.constant 0 : i32
    return %c0_i32, %arg0 : i32, i32
  }
  func.func @transform_2(%arg0: i32) -> (i32, i32) {
    %c0_i32 = arith.constant 0 : i32
    %c0_i32_0 = arith.constant 0 : i32
    return %c0_i32, %arg0 : i32, i32
  }
  func.func @transform_3(%arg0: i32) -> (i32, i32) {
    %c0_i32 = arith.constant 0 : i32
    %c0_i32_0 = arith.constant 0 : i32
    return %c0_i32, %arg0 : i32, i32
  }
}

</mosaic_0001>

<bundles_post_ra>
// kernel: _step.7
= control target key start
LH: loop header
LB: loop body
LE: loop exit
PB: predicated region body
PF: predicated region fallthrough
CT: control target
= control target key end

     0   :  { %9 = vsyncpa [#allocation4], 0  ;;  %s159_s0 = inlined_call_operand.<no memory space> [shape: f32[1], index: 0, kind: input, shape index: {}]   ;;  %s160_s1 = inlined_call_operand.hbm [shape: f32[1,10], index: 1, kind: input, shape index: {}, may-alias: {1,3}]   ;;  %s161_s2 = inlined_call_operand.vmem [shape: f32[1,10], index: 2, kind: input, shape index: {}]   ;;  %s162_s3 = inlined_call_operand.hbm [shape: f32[1,10], index: 3, kind: output, shape index: {}, may-alias: {1,3}]  }
   0x1   :  { %10 = vsyncpa [#allocation5], 0  ;;  %s104_s12 = smov [#allocation3]   ;;  %s56_s16 = scalar_lea.hbm %s160_s1, 16 }
   0x2   :  { %s19_s13 = sshll.u32 %s104_s12, 4  ;;  %p57_p0 = scmp.ne.s32.totalorder %s160_s1, %s56_s16  ;;  %s20_s13 = int_to_ptr.vmem [resolvable:$true] %s19_s13 }
   0x3   :  { %p60_p1 = scmp.lt.u32.totalorder %s56_s16, %s160_s1 }
   0x5   :  { %p62_p2 = pnand %p60_p1, %p57_p0 }
   0x7   :  { %65 = shalt.err (!%p62_p2)
}
   0x8   :  { %s66_s21 = scalar_lea.vmem %s20_s13, 16  ;;  %s70_s22 = scalar_lea.vmem %s20_s13, 32 }
   0x9   :  { %p67_p3 = scmp.ne.s32.totalorder %s20_s13, %s66_s21  ;;  %p71_p4 = scmp.lt.s32.totalorder %s20_s13, %s20_s13 }
   0xa   :  { %p72_p5 = scmp.lt.s32.totalorder %s70_s22, %s66_s21 }
   0xc   :  { %p73_p6 = por %p72_p5, %p71_p4 }
   0xe   :  { %p74_p7 = pnand %p73_p6, %p67_p3 }
  0x10   :  { %77 = shalt.err (!%p74_p7)
}
  0x11   :  { %22 = dma.hbm_to_vmem [thread:$0]  %s160_s1, 16, %s20_s13, [#allocation4]  }
  0x12   :  { %100 = dma.done.wait [#allocation4], 16  }
  0x13   :  { %101 = vsyncadd [#allocation4], 4294967280  ;;  %s33_s27 = ssub.f32 1.0, %s159_s0  ;;  %v31_v0 = vstv %s159_s0  ;;  %v28_v2 = vld [vmem:[#allocation3] sm:$0x1]  ;;  %s105_s5 = smov [#allocation6]  }
  0x14   :  { %v29_v3 = vld [vmem:[%s161_s2] sm:$0x1]  ;;  %s45_s6 = sshll.u32 %s105_s5, 4  ;;  %v32_v4 = vmul.f32 %v31_v0, %v28_v2  ;;  %vm37_vm0 = vcmask 73728   ;;  %s46_s6 = int_to_ptr.vmem [resolvable:$true] %s45_s6 }
  0x15   :  { %v34_v1 = vstv %s33_s27  ;;  %s78_s1 = scalar_lea.vmem %s46_s6, 16  ;;  %s82_s7 = scalar_lea.vmem %s46_s6, 32 }
  0x16   :  { %v35_v5 = vmul.f32 %v34_v1, %v29_v3  ;;  %p79_p8 = scmp.ne.s32.totalorder %s46_s6, %s78_s1  ;;  %p83_p9 = scmp.lt.s32.totalorder %s46_s6, %s46_s6 }
  0x17   :  { %p84_p10 = scmp.lt.s32.totalorder %s82_s7, %s78_s1 }
  0x18   :  { %v36_v6 = vadd.f32 %v35_v5, %v32_v4 }
  0x19   :  { %p85_p11 = por %p84_p10, %p83_p9 }
  0x1a   :  { %38 = vst.msk [vmem:[#allocation6] sm:$0x1] %vm37_vm0, %v36_v6 }
  0x1b   :  { %p86_p12 = pnand %p85_p11, %p79_p8 }
  0x1d   :  { %89 = shalt.err (!%p86_p12)
}
  0x1e   :  { %s90_s2 = scalar_lea.hbm %s162_s3, 16 }
  0x1f   :  { %p91_p13 = scmp.ne.s32.totalorder %s162_s3, %s90_s2  ;;  %p94_p0 = scmp.lt.u32.totalorder %s90_s2, %s162_s3 }
  0x21   :  { %p96_p1 = pnand %p94_p0, %p91_p13 }
  0x23   :  { %99 = shalt.err (!%p96_p1)
}
  0x24   :  { %48 = dma.vmem_to_hbm [thread:$0]  %s46_s6, 16, %s162_s3, [#allocation5]  }
  0x25   :  { %102 = dma.done.wait [#allocation5], 16  }
  0x26   :  { %103 = vsyncadd [#allocation5], 4294967280 }
  0x27   :  { %52 = vsyncpa [#allocation4], 1 }
  0x28   :  { %53 = vsyncpa [#allocation5], 1 }

// kernel: _step.5
= control target key start
LH: loop header
LB: loop body
LE: loop exit
PB: predicated region body
PF: predicated region fallthrough
CT: control target
= control target key end

     0   :  { %9 = vsyncpa [#allocation4], 0  ;;  %s159_s0 = inlined_call_operand.<no memory space> [shape: f32[1], index: 0, kind: input, shape index: {}]   ;;  %s160_s1 = inlined_call_operand.hbm [shape: f32[1,4], index: 1, kind: input, shape index: {}, may-alias: {1,3}]   ;;  %s161_s2 = inlined_call_operand.vmem [shape: f32[1,4], index: 2, kind: input, shape index: {}]   ;;  %s162_s3 = inlined_call_operand.hbm [shape: f32[1,4], index: 3, kind: output, shape index: {}, may-alias: {1,3}]  }
   0x1   :  { %10 = vsyncpa [#allocation5], 0  ;;  %s104_s12 = smov [#allocation3]   ;;  %s56_s16 = scalar_lea.hbm %s160_s1, 16 }
   0x2   :  { %s19_s13 = sshll.u32 %s104_s12, 4  ;;  %p57_p0 = scmp.ne.s32.totalorder %s160_s1, %s56_s16  ;;  %s20_s13 = int_to_ptr.vmem [resolvable:$true] %s19_s13 }
   0x3   :  { %p60_p1 = scmp.lt.u32.totalorder %s56_s16, %s160_s1 }
   0x5   :  { %p62_p2 = pnand %p60_p1, %p57_p0 }
   0x7   :  { %65 = shalt.err (!%p62_p2)
}
   0x8   :  { %s66_s21 = scalar_lea.vmem %s20_s13, 16  ;;  %s70_s22 = scalar_lea.vmem %s20_s13, 32 }
   0x9   :  { %p67_p3 = scmp.ne.s32.totalorder %s20_s13, %s66_s21  ;;  %p71_p4 = scmp.lt.s32.totalorder %s20_s13, %s20_s13 }
   0xa   :  { %p72_p5 = scmp.lt.s32.totalorder %s70_s22, %s66_s21 }
   0xc   :  { %p73_p6 = por %p72_p5, %p71_p4 }
   0xe   :  { %p74_p7 = pnand %p73_p6, %p67_p3 }
  0x10   :  { %77 = shalt.err (!%p74_p7)
}
  0x11   :  { %22 = dma.hbm_to_vmem [thread:$0]  %s160_s1, 16, %s20_s13, [#allocation4]  }
  0x12   :  { %100 = dma.done.wait [#allocation4], 16  }
  0x13   :  { %101 = vsyncadd [#allocation4], 4294967280  ;;  %s33_s27 = ssub.f32 1.0, %s159_s0  ;;  %v31_v0 = vstv %s159_s0  ;;  %v28_v2 = vld [vmem:[#allocation3] sm:$0x1]  ;;  %s105_s5 = smov [#allocation6]  }
  0x14   :  { %v29_v3 = vld [vmem:[%s161_s2] sm:$0x1]  ;;  %s45_s6 = sshll.u32 %s105_s5, 4  ;;  %v32_v4 = vmul.f32 %v31_v0, %v28_v2  ;;  %vm37_vm0 = vcmask 24576   ;;  %s46_s6 = int_to_ptr.vmem [resolvable:$true] %s45_s6 }
  0x15   :  { %v34_v1 = vstv %s33_s27  ;;  %s78_s1 = scalar_lea.vmem %s46_s6, 16  ;;  %s82_s7 = scalar_lea.vmem %s46_s6, 32 }
  0x16   :  { %v35_v5 = vmul.f32 %v34_v1, %v29_v3  ;;  %p79_p8 = scmp.ne.s32.totalorder %s46_s6, %s78_s1  ;;  %p83_p9 = scmp.lt.s32.totalorder %s46_s6, %s46_s6 }
  0x17   :  { %p84_p10 = scmp.lt.s32.totalorder %s82_s7, %s78_s1 }
  0x18   :  { %v36_v6 = vadd.f32 %v35_v5, %v32_v4 }
  0x19   :  { %p85_p11 = por %p84_p10, %p83_p9 }
  0x1a   :  { %38 = vst.msk [vmem:[#allocation6] sm:$0x1] %vm37_vm0, %v36_v6 }
  0x1b   :  { %p86_p12 = pnand %p85_p11, %p79_p8 }
  0x1d   :  { %89 = shalt.err (!%p86_p12)
}
  0x1e   :  { %s90_s2 = scalar_lea.hbm %s162_s3, 16 }
  0x1f   :  { %p91_p13 = scmp.ne.s32.totalorder %s162_s3, %s90_s2  ;;  %p94_p0 = scmp.lt.u32.totalorder %s90_s2, %s162_s3 }
  0x21   :  { %p96_p1 = pnand %p94_p0, %p91_p13 }
  0x23   :  { %99 = shalt.err (!%p96_p1)
}
  0x24   :  { %48 = dma.vmem_to_hbm [thread:$0]  %s46_s6, 16, %s162_s3, [#allocation5]  }
  0x25   :  { %102 = dma.done.wait [#allocation5], 16  }
  0x26   :  { %103 = vsyncadd [#allocation5], 4294967280 }
  0x27   :  { %52 = vsyncpa [#allocation4], 1 }
  0x28   :  { %53 = vsyncpa [#allocation5], 1 }

// kernel: _step.6
= control target key start
LH: loop header
LB: loop body
LE: loop exit
PB: predicated region body
PF: predicated region fallthrough
CT: control target
= control target key end

     0   :  { %vm24_vm0 = vcmask 162816   ;;  %s65_s0 = inlined_call_operand.<no memory space> [shape: f32[1], index: 0, kind: input, shape index: {}]   ;;  %s66_s1 = inlined_call_operand.vmem [shape: f32[8,20], index: 1, kind: input, shape index: {}, may-alias: {1,3}]   ;;  %s67_s2 = inlined_call_operand.vmem [shape: f32[8,20], index: 2, kind: input, shape index: {}]   ;;  %s68_s3 = inlined_call_operand.vmem [shape: f32[8,20], index: 3, kind: output, shape index: {}, may-alias: {1,3}]  }
   0x1   :  { %v15_v0 = vld [vmem:[%s66_s1] sm:$0xff]  ;;  %v18_v2 = vstv %s65_s0  ;;  %s20_s20 = ssub.f32 1.0, %s65_s0 }
   0x2   :  { %v16_v1 = vld [vmem:[%s67_s2] sm:$0xff]  ;;  %v19_v3 = vmul.f32 %v18_v2, %v15_v0 }
   0x3   :  { %v21_v4 = vstv %s20_s20 }
   0x4   :  { %v22_v5 = vmul.f32 %v21_v4, %v16_v1 }
   0x6   :  { %v23_v6 = vadd.f32 %v22_v5, %v19_v3 }
   0x8   :  { %25 = vst.msk [vmem:[%s68_s3] sm:$0xff] %vm24_vm0, %v23_v6 }

// kernel: _step.4
= control target key start
LH: loop header
LB: loop body
LE: loop exit
PB: predicated region body
PF: predicated region fallthrough
CT: control target
= control target key end

     0   :  { %vm24_vm0 = vcmask 876544   ;;  %s65_s0 = inlined_call_operand.<no memory space> [shape: f32[1], index: 0, kind: input, shape index: {}]   ;;  %s66_s1 = inlined_call_operand.vmem [shape: f32[1,108], index: 1, kind: input, shape index: {}, may-alias: {1,3}]   ;;  %s67_s2 = inlined_call_operand.vmem [shape: f32[1,108], index: 2, kind: input, shape index: {}]   ;;  %s68_s3 = inlined_call_operand.vmem [shape: f32[1,108], index: 3, kind: output, shape index: {}, may-alias: {1,3}]  }
   0x1   :  { %v15_v0 = vld [vmem:[%s66_s1] sm:$0x1]  ;;  %v18_v2 = vstv %s65_s0  ;;  %s20_s20 = ssub.f32 1.0, %s65_s0 }
   0x2   :  { %v16_v1 = vld [vmem:[%s67_s2] sm:$0x1]  ;;  %v19_v3 = vmul.f32 %v18_v2, %v15_v0 }
   0x3   :  { %v21_v4 = vstv %s20_s20 }
   0x4   :  { %v22_v5 = vmul.f32 %v21_v4, %v16_v1 }
   0x6   :  { %v23_v6 = vadd.f32 %v22_v5, %v19_v3 }
   0x8   :  { %25 = vst.msk [vmem:[%s68_s3] sm:$0x1] %vm24_vm0, %v23_v6 }

</bundles_post_ra>
